<compile_context>
chip_gen: v7x
topology: tpu7x:2x2x1
jax: 0.10.0
libtpu: 0.0.40
codegen_flags: <defaults>
</compile_context>

<pallas_src>
import functools

import jax
import jax.numpy as jnp
from jax.experimental import pallas as pl
from jax.experimental.pallas import tpu as pltpu

H1, H2 = 32, 64  # hidden widths fixed by the PyTorch module


def _mlp_kernel(a_ref, x_ref, w1_ref, tbl_ref, w2_ref, b2_ref, w3_ref, b3_ref,
                o_ref, *, nA, compute_dtype):
    """Feature-major fused MLP on one batch tile: y^T = MLP(x^T)."""
    xT = x_ref[...]                      # (emb, Bt)  compute_dtype
    a = a_ref[...]                       # (1, Bt)    int32

    # Layer 1 matmul on the MXU, f32 accumulation: (H1, emb) @ (emb, Bt).
    h1 = jnp.dot(w1_ref[...], xT, preferred_element_type=jnp.float32)

    # one_hot(action) @ W1a + b1 as nA VPU selects against the precomputed
    # (H1, nA) table (column k = b1 + W1a[k, :]).  Exactly one class matches
    # per column, so the select chain reproduces the one-hot matmul exactly.
    sel = jnp.where(a == 0, tbl_ref[:, 0:1], 0.0)            # (H1, Bt) f32
    for k in range(1, nA):
        sel = jnp.where(a == k, tbl_ref[:, k:k + 1], sel)

    h1 = jnp.maximum(h1 + sel, 0.0)                           # (H1, Bt) f32

    # Layer 2: (H2, H1) @ (H1, Bt); bias add / ReLU in f32 on the VPU.
    h2 = jnp.dot(w2_ref[...], h1.astype(compute_dtype),
                 preferred_element_type=jnp.float32) + b2_ref[...]
    h2 = jnp.maximum(h2, 0.0)                                 # (H2, Bt) f32

    # Layer 3: (emb, H2) @ (H2, Bt).
    y = jnp.dot(w3_ref[...], h2.astype(compute_dtype),
                preferred_element_type=jnp.float32) + b3_ref[...]
    o_ref[...] = y.astype(o_ref.dtype)


def _round_up(x, m):
    return ((x + m - 1) // m) * m


def _choose_b_tile(B):
    """Whole batch for small B; otherwise 128-aligned tiles <= 2048 rows with
    an even grid length so both v7x TensorCores get work."""
    if B <= 1024:
        return B
    n_tiles = 2 * pl.cdiv(B, 2 * 2048)          # even count, each tile <= 2048
    return _round_up(pl.cdiv(B, n_tiles), 128)


def prepare_params(params, embedding_size, nA, compute_dtype=jnp.bfloat16):
    """Convert (w1,b1,w2,b2,w3,b3) in (in,out) layout into kernel operands.

    Returns (w1eT, tbl, w2T, b2c, w3T, b3c):
      w1eT : (H1, emb)  ob_emb rows of layer-1 weights, transposed   compute_dtype
      tbl  : (H1, nA)   column k = b1 + W1[emb+k, :]                 float32
      w2T  : (H2, H1)                                                compute_dtype
      b2c  : (H2, 1)                                                 float32
      w3T  : (emb, H2)                                               compute_dtype
      b3c  : (emb, 1)                                                float32
    """
    w1, b1, w2, b2, w3, b3 = params
    emb = embedding_size
    w1eT = jnp.transpose(w1[:emb]).astype(compute_dtype)
    tbl = jnp.transpose(w1[emb:emb + nA] + b1[None, :]).astype(jnp.float32)
    w2T = jnp.transpose(w2).astype(compute_dtype)
    b2c = b2.reshape(H2, 1).astype(jnp.float32)
    w3T = jnp.transpose(w3).astype(compute_dtype)
    b3c = b3.reshape(emb, 1).astype(jnp.float32)
    return (w1eT, tbl, w2T, b2c, w3T, b3c)


def dis_forward_dynamic_model_t(ob_emb_t, true_action, kernel_params, *, nA,
                                b_tile=None, out_dtype=jnp.float32):
    """Feature-major entry point: x^T of shape (emb, B) -> y^T of shape (emb, B)."""
    w1eT, tbl, w2T, b2c, w3T, b3c = kernel_params
    emb, B = ob_emb_t.shape
    compute_dtype = ob_emb_t.dtype
    a_row = true_action.reshape(1, B).astype(jnp.int32)

    if b_tile is None:
        b_tile = _choose_b_tile(B)
    grid = (pl.cdiv(B, b_tile),)     # non-divisible B -> padded last block,
                                     # out-of-range lanes are masked on store

    kernel = functools.partial(_mlp_kernel, nA=nA, compute_dtype=compute_dtype)

    flops = 2 * B * (emb * H1 + H1 * H2 + H2 * emb)
    itemsize = jnp.dtype(compute_dtype).itemsize
    bytes_accessed = (
        itemsize * (ob_emb_t.size + w1eT.size + w2T.size + w3T.size)
        + 4 * (a_row.size + tbl.size + b2c.size + b3c.size + B * emb))

    return pl.pallas_call(
        kernel,
        out_shape=jax.ShapeDtypeStruct((emb, B), out_dtype),
        grid=grid,
        in_specs=[
            pl.BlockSpec((1, b_tile), lambda i: (0, i)),      # action ids
            pl.BlockSpec((emb, b_tile), lambda i: (0, i)),    # x^T tile
            pl.BlockSpec(w1eT.shape, lambda i: (0, 0)),       # layer-1 weights
            pl.BlockSpec(tbl.shape, lambda i: (0, 0)),        # b1 + action table
            pl.BlockSpec(w2T.shape, lambda i: (0, 0)),        # layer-2 weights
            pl.BlockSpec(b2c.shape, lambda i: (0, 0)),        # layer-2 bias
            pl.BlockSpec(w3T.shape, lambda i: (0, 0)),        # layer-3 weights
            pl.BlockSpec(b3c.shape, lambda i: (0, 0)),        # layer-3 bias
        ],
        out_specs=pl.BlockSpec((emb, b_tile), lambda i: (0, i)),
        compiler_params=pltpu.CompilerParams(
            dimension_semantics=("parallel",)),
        cost_estimate=pl.CostEstimate(
            flops=flops, transcendentals=0, bytes_accessed=bytes_accessed),
    )(a_row, ob_emb_t, w1eT, tbl, w2T, b2c, w3T, b3c)


def dis_forward_dynamic_model(ob_emb, true_action, kernel_params, *, nA,
                              compute_dtype=jnp.bfloat16, b_tile=None):
    """PyTorch-signature wrapper: (B, emb) in -> (B, emb) float32 out.

    The transposes are layout plumbing; if the surrounding model can supply /
    consume feature-major embeddings, call dis_forward_dynamic_model_t
    directly and skip them.
    """
    xT = jnp.transpose(ob_emb).astype(compute_dtype)
    yT = dis_forward_dynamic_model_t(xT, true_action, kernel_params, nA=nA,
                                     b_tile=b_tile)
    return jnp.transpose(yT)


def init_params(key, embedding_size, nA):
    """PyTorch nn.Linear default init (U[-1/sqrt(fan_in), +]); (in, out) layout."""
    d_in = embedding_size + nA
    dims = [(d_in, H1), (H1, H2), (H2, embedding_size)]
    params = []
    for fan_in, fan_out in dims:
        key, kw, kb = jax.random.split(key, 3)
        bound = 1.0 / (fan_in ** 0.5)
        w = jax.random.uniform(kw, (fan_in, fan_out), jnp.float32, -bound, bound)
        b = jax.random.uniform(kb, (fan_out,), jnp.float32, -bound, bound)
        params += [w, b]
    return tuple(params)


def reference(ob_emb, true_action, params, nA):
    w1, b1, w2, b2, w3, b3 = params
    onehot = jax.nn.one_hot(true_action, nA, dtype=jnp.float32)
    x = jnp.concatenate([ob_emb, onehot], axis=1)
    h = jnp.maximum(x @ w1 + b1, 0.0)
    h = jnp.maximum(h @ w2 + b2, 0.0)
    return h @ w3 + b3


if __name__ == "__main__":
    embedding_size = 32
    nA = 4              # action_shape == nA for the discrete (one-hot) model

    key = jax.random.PRNGKey(0)
    k_params, k_obs, k_act = jax.random.split(key, 3)
    params = init_params(k_params, embedding_size, nA)

    # Check 1: f32 operands, small batch, single block (exact-parity path).
    B = 8
    ob_emb = jax.random.normal(k_obs, (B, embedding_size), jnp.float32)
    true_action = jax.random.randint(k_act, (B,), 0, nA, jnp.int32)
    packed_f32 = prepare_params(params, embedding_size, nA, jnp.float32)
    pred = dis_forward_dynamic_model(ob_emb, true_action, packed_f32, nA=nA,
                                     compute_dtype=jnp.float32)
    pred = jax.block_until_ready(pred)
    ref = reference(ob_emb, true_action, params, nA)
    assert pred.shape == (B, embedding_size)
    assert jnp.allclose(pred, ref, atol=1e-3, rtol=1e-3), (
        float(jnp.max(jnp.abs(pred - ref))))

    # Check 2: bf16 operands (default perf config), multi-tile grid with a
    # padded final block (B=200 not divisible by the 128-row tile).
    B2 = 200
    k_obs2, k_act2 = jax.random.split(jax.random.PRNGKey(1))
    ob_emb2 = jax.random.normal(k_obs2, (B2, embedding_size), jnp.float32)
    true_action2 = jax.random.randint(k_act2, (B2,), 0, nA, jnp.int32)
    packed_bf16 = prepare_params(params, embedding_size, nA, jnp.bfloat16)
    pred2 = dis_forward_dynamic_model(ob_emb2, true_action2, packed_bf16,
                                      nA=nA, compute_dtype=jnp.bfloat16,
                                      b_tile=128)
    pred2 = jax.block_until_ready(pred2)
    ref2 = reference(ob_emb2, true_action2, params, nA)
    assert pred2.shape == (B2, embedding_size)
    assert jnp.allclose(pred2, ref2, atol=5e-2, rtol=5e-2), (
        float(jnp.max(jnp.abs(pred2 - ref2))))

    print("KERNEL_OK")
</pallas_src>

<mosaic_0001>
module attributes {stable_mosaic.version = 11 : i64} {
  func.func @_mlp_kernel(%arg0: i32, %arg1: memref<1x8xi32, #tpu.memory_space<vmem>>, %arg2: memref<32x8xf32, #tpu.memory_space<vmem>>, %arg3: memref<32x32xf32, #tpu.memory_space<vmem>>, %arg4: memref<32x4xf32, #tpu.memory_space<vmem>>, %arg5: memref<64x32xf32, #tpu.memory_space<vmem>>, %arg6: memref<64x1xf32, #tpu.memory_space<vmem>>, %arg7: memref<32x64xf32, #tpu.memory_space<vmem>>, %arg8: memref<32x1xf32, #tpu.memory_space<vmem>>, %arg9: memref<32x8xf32, #tpu.memory_space<vmem>>) attributes {dimension_semantics = [#tpu.dimension_semantics<parallel>], iteration_bounds = array<i64: 1>, scalar_prefetch = 0 : i64, scratch_operands = 0 : i64, tpu.core_type = #tpu.core_type<tc>, window_params = [{transform_indices = @transform_0, window_bounds = array<i64: 1, 8>}, {transform_indices = @transform_1, window_bounds = array<i64: 32, 8>}, {pipeline_mode = #tpu.pipeline_mode<synchronous>, transform_indices = @transform_2, window_bounds = array<i64: 32, 32>}, {pipeline_mode = #tpu.pipeline_mode<synchronous>, transform_indices = @transform_3, window_bounds = array<i64: 32, 4>}, {pipeline_mode = #tpu.pipeline_mode<synchronous>, transform_indices = @transform_4, window_bounds = array<i64: 64, 32>}, {pipeline_mode = #tpu.pipeline_mode<synchronous>, transform_indices = @transform_5, window_bounds = array<i64: 64, 1>}, {pipeline_mode = #tpu.pipeline_mode<synchronous>, transform_indices = @transform_6, window_bounds = array<i64: 32, 64>}, {pipeline_mode = #tpu.pipeline_mode<synchronous>, transform_indices = @transform_7, window_bounds = array<i64: 32, 1>}, {transform_indices = @transform_8, window_bounds = array<i64: 32, 8>}]} {
    %c0 = arith.constant 0 : index
    %c0_0 = arith.constant 0 : index
    %0 = vector.load %arg2[%c0, %c0_0] : memref<32x8xf32, #tpu.memory_space<vmem>>, vector<32x8xf32>
    %c0_1 = arith.constant 0 : index
    %c0_2 = arith.constant 0 : index
    %1 = vector.load %arg1[%c0_1, %c0_2] : memref<1x8xi32, #tpu.memory_space<vmem>>, vector<1x8xi32>
    %c0_3 = arith.constant 0 : index
    %c0_4 = arith.constant 0 : index
    %2 = vector.load %arg3[%c0_3, %c0_4] : memref<32x32xf32, #tpu.memory_space<vmem>>, vector<32x32xf32>
    %cst = arith.constant dense<0.000000e+00> : vector<32x8xf32>
    %3 = tpu.matmul %2, %0, %cst {dimension_numbers = #tpu.dot_dimension_numbers<[1], [0], [0], [1], [0, 0, 1, 1], [], []>} : vector<32x32xf32>, vector<32x8xf32>, vector<32x8xf32> -> vector<32x8xf32>
    %c0_i32 = arith.constant 0 : i32
    %4 = vector.broadcast %c0_i32 : i32 to vector<1x8xi32>
    %5 = arith.cmpi eq, %1, %4 : vector<1x8xi32>
    %c0_5 = arith.constant 0 : index
    %c0_6 = arith.constant 0 : index
    %6 = vector.load %arg4[%c0_5, %c0_6] : memref<32x4xf32, #tpu.memory_space<vmem>>, vector<32x1xf32>
    %cst_7 = arith.constant 0.000000e+00 : f32
    %7 = vector.shape_cast %5 : vector<1x8xi1> to vector<1x8xi1>
    %8 = vector.broadcast %7 : vector<1x8xi1> to vector<32x8xi1>
    %9 = vector.shape_cast %6 : vector<32x1xf32> to vector<32x1xf32>
    %10 = vector.broadcast %9 : vector<32x1xf32> to vector<32x8xf32>
    %11 = vector.broadcast %cst_7 : f32 to vector<32x8xf32>
    %12 = arith.select %8, %10, %11 : vector<32x8xi1>, vector<32x8xf32>
    %c1_i32 = arith.constant 1 : i32
    %13 = vector.broadcast %c1_i32 : i32 to vector<1x8xi32>
    %14 = arith.cmpi eq, %1, %13 : vector<1x8xi32>
    %c0_8 = arith.constant 0 : index
    %c1 = arith.constant 1 : index
    %15 = vector.load %arg4[%c0_8, %c1] : memref<32x4xf32, #tpu.memory_space<vmem>>, vector<32x1xf32>
    %16 = vector.shape_cast %14 : vector<1x8xi1> to vector<1x8xi1>
    %17 = vector.broadcast %16 : vector<1x8xi1> to vector<32x8xi1>
    %18 = vector.shape_cast %15 : vector<32x1xf32> to vector<32x1xf32>
    %19 = vector.broadcast %18 : vector<32x1xf32> to vector<32x8xf32>
    %20 = arith.select %17, %19, %12 : vector<32x8xi1>, vector<32x8xf32>
    %c2_i32 = arith.constant 2 : i32
    %21 = vector.broadcast %c2_i32 : i32 to vector<1x8xi32>
    %22 = arith.cmpi eq, %1, %21 : vector<1x8xi32>
    %c0_9 = arith.constant 0 : index
    %c2 = arith.constant 2 : index
    %23 = vector.load %arg4[%c0_9, %c2] : memref<32x4xf32, #tpu.memory_space<vmem>>, vector<32x1xf32>
    %24 = vector.shape_cast %22 : vector<1x8xi1> to vector<1x8xi1>
    %25 = vector.broadcast %24 : vector<1x8xi1> to vector<32x8xi1>
    %26 = vector.shape_cast %23 : vector<32x1xf32> to vector<32x1xf32>
    %27 = vector.broadcast %26 : vector<32x1xf32> to vector<32x8xf32>
    %28 = arith.select %25, %27, %20 : vector<32x8xi1>, vector<32x8xf32>
    %c3_i32 = arith.constant 3 : i32
    %29 = vector.broadcast %c3_i32 : i32 to vector<1x8xi32>
    %30 = arith.cmpi eq, %1, %29 : vector<1x8xi32>
    %c0_10 = arith.constant 0 : index
    %c3 = arith.constant 3 : index
    %31 = vector.load %arg4[%c0_10, %c3] : memref<32x4xf32, #tpu.memory_space<vmem>>, vector<32x1xf32>
    %32 = vector.shape_cast %30 : vector<1x8xi1> to vector<1x8xi1>
    %33 = vector.broadcast %32 : vector<1x8xi1> to vector<32x8xi1>
    %34 = vector.shape_cast %31 : vector<32x1xf32> to vector<32x1xf32>
    %35 = vector.broadcast %34 : vector<32x1xf32> to vector<32x8xf32>
    %36 = arith.select %33, %35, %28 : vector<32x8xi1>, vector<32x8xf32>
    %37 = arith.addf %3, %36 : vector<32x8xf32>
    %cst_11 = arith.constant 0.000000e+00 : f32
    %38 = vector.broadcast %cst_11 : f32 to vector<32x8xf32>
    %39 = arith.maximumf %37, %38 : vector<32x8xf32>
    %c0_12 = arith.constant 0 : index
    %c0_13 = arith.constant 0 : index
    %40 = vector.load %arg5[%c0_12, %c0_13] : memref<64x32xf32, #tpu.memory_space<vmem>>, vector<64x32xf32>
    %cst_14 = arith.constant dense<0.000000e+00> : vector<64x8xf32>
    %41 = tpu.matmul %40, %39, %cst_14 {dimension_numbers = #tpu.dot_dimension_numbers<[1], [0], [0], [1], [0, 0, 1, 1], [], []>} : vector<64x32xf32>, vector<32x8xf32>, vector<64x8xf32> -> vector<64x8xf32>
    %c0_15 = arith.constant 0 : index
    %c0_16 = arith.constant 0 : index
    %42 = vector.load %arg6[%c0_15, %c0_16] : memref<64x1xf32, #tpu.memory_space<vmem>>, vector<64x1xf32>
    %43 = vector.broadcast %42 : vector<64x1xf32> to vector<64x8xf32>
    %44 = arith.addf %41, %43 : vector<64x8xf32>
    %cst_17 = arith.constant 0.000000e+00 : f32
    %45 = vector.broadcast %cst_17 : f32 to vector<64x8xf32>
    %46 = arith.maximumf %44, %45 : vector<64x8xf32>
    %c0_18 = arith.constant 0 : index
    %c0_19 = arith.constant 0 : index
    %47 = vector.load %arg7[%c0_18, %c0_19] : memref<32x64xf32, #tpu.memory_space<vmem>>, vector<32x64xf32>
    %cst_20 = arith.constant dense<0.000000e+00> : vector<32x8xf32>
    %48 = tpu.matmul %47, %46, %cst_20 {dimension_numbers = #tpu.dot_dimension_numbers<[1], [0], [0], [1], [0, 0, 1, 1], [], []>} : vector<32x64xf32>, vector<64x8xf32>, vector<32x8xf32> -> vector<32x8xf32>
    %c0_21 = arith.constant 0 : index
    %c0_22 = arith.constant 0 : index
    %49 = vector.load %arg8[%c0_21, %c0_22] : memref<32x1xf32, #tpu.memory_space<vmem>>, vector<32x1xf32>
    %50 = vector.broadcast %49 : vector<32x1xf32> to vector<32x8xf32>
    %51 = arith.addf %48, %50 : vector<32x8xf32>
    %c0_23 = arith.constant 0 : index
    %c0_24 = arith.constant 0 : index
    %52 = vector.load %arg9[%c0_23, %c0_24] : memref<32x8xf32, #tpu.memory_space<vmem>>, vector<32x8xf32>
    tpu.vector_store %arg9[%c0_23, %c0_24], %51 {strides = array<i32>} : memref<32x8xf32, #tpu.memory_space<vmem>>, vector<32x8xf32>,
    return
  }
  func.func @transform_0(%arg0: i32) -> (i32, i32) {
    %c0_i32 = arith.constant 0 : i32
    %c0_i32_0 = arith.constant 0 : i32
    return %c0_i32, %arg0 : i32, i32
  }
  func.func @transform_1(%arg0: i32) -> (i32, i32) {
    %c0_i32 = arith.constant 0 : i32
    %c0_i32_0 = arith.constant 0 : i32
    return %c0_i32, %arg0 : i32, i32
  }
  func.func @transform_2(%arg0: i32) -> (i32, i32) {
    %c0_i32 = arith.constant 0 : i32
    %c0_i32_0 = arith.constant 0 : i32
    %c0_i32_1 = arith.constant 0 : i32
    return %c0_i32, %c0_i32_0 : i32, i32
  }
  func.func @transform_3(%arg0: i32) -> (i32, i32) {
    %c0_i32 = arith.constant 0 : i32
    %c0_i32_0 = arith.constant 0 : i32
    %c0_i32_1 = arith.constant 0 : i32
    return %c0_i32, %c0_i32_0 : i32, i32
  }
  func.func @transform_4(%arg0: i32) -> (i32, i32) {
    %c0_i32 = arith.constant 0 : i32
    %c0_i32_0 = arith.constant 0 : i32
    %c0_i32_1 = arith.constant 0 : i32
    return %c0_i32, %c0_i32_0 : i32, i32
  }
  func.func @transform_5(%arg0: i32) -> (i32, i32) {
    %c0_i32 = arith.constant 0 : i32
    %c0_i32_0 = arith.constant 0 : i32
    %c0_i32_1 = arith.constant 0 : i32
    return %c0_i32, %c0_i32_0 : i32, i32
  }
  func.func @transform_6(%arg0: i32) -> (i32, i32) {
    %c0_i32 = arith.constant 0 : i32
    %c0_i32_0 = arith.constant 0 : i32
    %c0_i32_1 = arith.constant 0 : i32
    return %c0_i32, %c0_i32_0 : i32, i32
  }
  func.func @transform_7(%arg0: i32) -> (i32, i32) {
    %c0_i32 = arith.constant 0 : i32
    %c0_i32_0 = arith.constant 0 : i32
    %c0_i32_1 = arith.constant 0 : i32
    return %c0_i32, %c0_i32_0 : i32, i32
  }
  func.func @transform_8(%arg0: i32) -> (i32, i32) {
    %c0_i32 = arith.constant 0 : i32
    %c0_i32_0 = arith.constant 0 : i32
    return %c0_i32, %arg0 : i32, i32
  }
}

</mosaic_0001>

<bundles_post_ra>
// kernel: tpu_custom_call.1
= control target key start
LH: loop header
LB: loop body
LE: loop exit
PB: predicated region body
PF: predicated region fallthrough
CT: control target
= control target key end

     0   :  { %vm154_vm0 = vcmask 261120   ;;  %v745_v3 = vmov 1   ;;  %v746_v4 = vmov 0   ;;  %v747_v13 = vmov 2   ;;  %s989_s1 = inlined_call_operand.vmem [shape: f32[32,8], index: 1, kind: input, shape index: {}]   ;;  %s990_s2 = inlined_call_operand.vmem [shape: f32[32,32], index: 2, kind: input, shape index: {}]   ;;  %s991_s3 = inlined_call_operand.vmem [shape: f32[32,4], index: 3, kind: input, shape index: {}]   ;;  %s992_s4 = inlined_call_operand.vmem [shape: f32[64,32], index: 4, kind: input, shape index: {}]   ;;  %s993_s5 = inlined_call_operand.vmem [shape: f32[64,1], index: 5, kind: input, shape index: {}]   ;;  %s994_s7 = inlined_call_operand.vmem [shape: f32[32,1], index: 7, kind: input, shape index: {}]   ;;  %s995_s0 = inlined_call_operand.vmem [shape: s32[1,8], index: 0, kind: input, shape index: {}]   ;;  %s996_s6 = inlined_call_operand.vmem [shape: f32[32,64], index: 6, kind: input, shape index: {}]   ;;  %s997_s8 = inlined_call_operand.vmem [shape: f32[32,8], index: 8, kind: output, shape index: {}]  }
   0x1   :  { %v29_v0 = vld [vmem:[%s989_s1] sm:$0xff]  ;;  %v30_v1 = vld [vmem:[%s989_s1 + $0x8] sm:$0xff]  ;;  %v31_v2 = vld [vmem:[%s989_s1 + $0x10] sm:$0xff]  ;;  %733 = vset.pattern.permute.xlu1 %v745_v3  ;;  %732 = vset.pattern.permute.xlu0 %v746_v4  ;;  %v748_v15 = vmov 3   ;;  %v44_v37 = vlaneseq  ;;  %vm477_vm9 = vcmask 523264   ;;  %vm575_vm10 = vcmask 64512  }
   0x2   :  { %v688_v5 = vpack.c.bf16 %v30_v1, %v29_v0  ;;  %v32_v6 = vld [vmem:[%s989_s1 + $0x18] sm:$0xff]  ;;  %v34_v7 = vld [vmem:[%s990_s2] sm:$0xff]  ;;  %v40_v10 = vld [vmem:[%s991_s3 + $0x8] sm:$0xff] }
   0x3   :  { %v692_v8 = vpack.c.bf16 %v32_v6, %v31_v2  ;;  %640 = vmatprep.mubr.msk.f32.mxu0 %vm154_vm0, %v34_v7  ;;  %v39_v9 = vld [vmem:[%s991_s3] sm:$0xff]  ;;  %v35_v11 = vld [vmem:[%s990_s2 + $0x8] sm:$0xff]  ;;  %v36_v12 = vld [vmem:[%s990_s2 + $0x10] sm:$0xff]  ;;  %v45_v39 = vshrl.u32 %v44_v37, 7 }
   0x4   :  { %689 = vmatprep.subr.bf16.mxu0 %v688_v5  ;;  %81 = vperm.xlu1 %733, %v39_v9   ;;  %v37_v14 = vld [vmem:[%s990_s2 + $0x18] sm:$0xff]  ;;  %v41_v16 = vld [vmem:[%s991_s3 + $0x10] sm:$0xff]  ;;  %v256_v18 = vld [vmem:[%s992_s4] sm:$0xff] }
   0x5   :  { %691 = vmatpush3.bf16.msra.mxu0 %v688_v5  ;;  %51 = vperm.xlu0 %732, %v39_v9   ;;  %v42_v17 = vld [vmem:[%s991_s3 + $0x18] sm:$0xff]  ;;  %v265_v19 = vld [vmem:[%s993_s5 + $0x8] sm:$0xff]  ;;  %v264_v20 = vld [vmem:[%s993_s5] sm:$0xff]  ;;  %v46_v42 = vsub.s32 0, %v45_v39 }
   0x6   :  { %693 = vmatprep.subr.bf16.mxu0 %v692_v8  ;;  %654 = vmatprep.mubr.msk.f32.mxu1 %vm154_vm0, %v256_v18  ;;  %v266_v21 = vld [vmem:[%s993_s5 + $0x10] sm:$0xff]  ;;  %v267_v22 = vld [vmem:[%s993_s5 + $0x18] sm:$0xff]  ;;  %v268_v23 = vld [vmem:[%s993_s5 + $0x20] sm:$0xff] }
   0x7   :  { %v269_v24 = vld [vmem:[%s993_s5 + $0x28] sm:$0xff]  ;;  %v270_v25 = vld [vmem:[%s993_s5 + $0x30] sm:$0xff]  ;;  %v271_v26 = vld [vmem:[%s993_s5 + $0x38] sm:$0xff] }
   0x8   :  { %85 = vperm.xlu1 %733, %v40_v10   ;;  %v453_v27 = vld [vmem:[%s994_s7] sm:$0xff]  ;;  %v454_v28 = vld [vmem:[%s994_s7 + $0x8] sm:$0xff]  ;;  %v455_v29 = vld [vmem:[%s994_s7 + $0x10] sm:$0xff] }
   0x9   :  { %695 = vmatpush3.bf16.msra.mxu0 %v692_v8  ;;  %56 = vperm.xlu0 %732, %v40_v10   ;;  %v456_v30 = vld [vmem:[%s994_s7 + $0x18] sm:$0xff]  ;;  %v33_v38 = vld [vmem:[%s995_s0] sm:$0x1]  ;;  %v451_v37 = vld [vmem:[%s996_s6 + $0x10] sm:$0xff] }
   0xa   :  { %vm38_vm1 = vcmp.eq.s32.totalorder %v33_v38, 0  ;;  %vm73_vm2 = vcmp.eq.s32.totalorder %v33_v38, 1  ;;  %vm100_vm3 = vcmp.eq.s32.totalorder %v33_v38, 2  ;;  %vm127_vm4 = vcmp.eq.s32.totalorder %v33_v38, 3 }
   0xb   :  { %v43_v43 = vsel %vm38_vm1, 1, %v746_v4  ;;  %v74_v47 = vsel %vm73_vm2, 1, %v746_v4  ;;  %v101_v49 = vsel %vm100_vm3, 1, %v746_v4  ;;  %v128_v54 = vsel %vm127_vm4, 1, %v746_v4 }
   0xc   :  { %641 = vmatmul.mubr.msk.f32.vlgmr.msra.gmra.mrb[0].mxu0 %vm154_vm0, %v35_v11  ;;  %734 = vset.pattern.permute.xlu1 %v747_v13  ;;  %v47_v46 = vrot.slane %v43_v43, %v46_v42  ;;  %v78_v48 = vrot.slane %v74_v47, %v46_v42  ;;  %v105_v53 = vrot.slane %v101_v49, %v46_v42 }
   0xd   :  { %643 = vmatprep.mubr.msk.f32.mxu0 %vm154_vm0, %v36_v12  ;;  %112 = vperm.xlu1 %734, %v40_v10   ;;  %v132_v58 = vrot.slane %v128_v54, %v46_v42 }
   0xe   :  { %736 = vset.pattern.permute.xlu0 %v748_v15  ;;  %vm884_vm5 = vcmp.eq.s32.totalorder %v47_v46, 1  ;;  %vm889_vm6 = vcmp.eq.s32.totalorder %v78_v48, 1  ;;  %vm899_vm7 = vcmp.eq.s32.totalorder %v105_v53, 1 }
   0xf   :  { %139 = vperm.xlu0 %736, %v40_v10   ;;  %vm911_vm8 = vcmp.eq.s32.totalorder %v132_v58, 1 }
  0x10   :  { %644 = vmatmul.mubr.msk.f32.gmra.mrb[2].mxu0 %vm154_vm0, %v37_v14 }
  0x11   :  { %735 = vset.pattern.permute.xlu1 %v748_v15 }
  0x12   :  { %135 = vperm.xlu1 %735, %v39_v9  }
  0x13   :  { %738 = vset.pattern.permute.xlu0 %v745_v3 }
  0x14   :  { %89 = vperm.xlu0 %738, %v41_v16  }
  0x16   :  { %737 = vset.pattern.permute.xlu1 %v746_v4 }
  0x17   :  { %61 = vperm.xlu1 %737, %v41_v16  }
  0x18   :  { %739 = vset.pattern.permute.xlu0 %v747_v13 }
  0x19   :  { %108 = vperm.xlu0 %739, %v39_v9  }
  0x1b   :  { %66 = vperm.xlu1 %737, %v42_v17  }
  0x1d   :  { %120 = vperm.xlu0 %739, %v42_v17  }
  0x1f   :  { %740 = vset.pattern.permute.xlu1 %v745_v3 }
  0x20   :  { %93 = vperm.xlu1 %740, %v42_v17  }
  0x21   :  { %743 = vset.pattern.permute.xlu0 %v746_v4 }
  0x22   :  { %274 = vperm.xlu0 %743, %v264_v20  }
  0x24   :  { %741 = vset.pattern.permute.xlu1 %v747_v13 }
  0x25   :  { %116 = vperm.xlu1 %741, %v41_v16  }
  0x26   :  { %289 = vperm.xlu0 %743, %v267_v22  }
  0x29   :  { %742 = vset.pattern.permute.xlu1 %v748_v15 }
  0x2a   :  { %143 = vperm.xlu1 %742, %v41_v16   ;;  %299 = vperm.xlu0 %743, %v269_v24  }
  0x2e   :  { %147 = vperm.xlu1 %742, %v42_v17   ;;  %309 = vperm.xlu0 %743, %v271_v26  }
  0x32   :  { %744 = vset.pattern.permute.xlu1 %v746_v4  ;;  %464 = vperm.xlu0 %743, %v454_v28  }
  0x33   :  { %279 = vperm.xlu1 %744, %v265_v19  }
  0x36   :  { %474 = vperm.xlu0 %743, %v456_v30   ;;  %v258_v30 = vld [vmem:[%s992_s4 + $0x10] sm:$0xff] }
  0x37   :  { %284 = vperm.xlu1 %744, %v266_v21  }
  0x3b   :  { %294 = vperm.xlu1 %744, %v268_v23  }
  0x3f   :  { %304 = vperm.xlu1 %744, %v270_v25  }
  0x43   :  { %459 = vperm.xlu1 %744, %v453_v27  }
  0x47   :  { %469 = vperm.xlu1 %744, %v455_v29   ;;  %v257_v29 = vld [vmem:[%s992_s4 + $0x8] sm:$0xff] }
  0x83   :  { %v82_v31 = vpop.permute.xlu1 %81 }
  0x84   :  { %v52_v35 = vpop.permute.xlu0 %51 }
  0x85   :  { %v69_v57 = vsel %vm884_vm5, %v52_v35, 0.0  ;;  %v263_v35 = vld [vmem:[%s992_s4 + $0x38] sm:$0xff] }
  0x86   :  { %v96_v62 = vsel %vm889_vm6, %v82_v31, %v69_v57  ;;  %v259_v31 = vld [vmem:[%s992_s4 + $0x18] sm:$0xff] }
  0x87   :  { %v86_v32 = vpop.permute.xlu1 %85 }
  0x88   :  { %v57_v40 = vpop.permute.xlu0 %56 }
  0x89   :  { %v70_v56 = vsel %vm884_vm5, %v57_v40, 0.0 }
  0x8a   :  { %v97_v59 = vsel %vm889_vm6, %v86_v32, %v70_v56  ;;  %v260_v32 = vld [vmem:[%s992_s4 + $0x20] sm:$0xff] }
  0x8c   :  { %v113_v33 = vpop.permute.xlu1 %112 }
  0x8d   :  { %v124_v2 = vsel %vm899_vm7, %v113_v33, %v97_v59  ;;  %v261_v33 = vld [vmem:[%s992_s4 + $0x28] sm:$0xff] }
  0x8e   :  { %v140_v44 = vpop.permute.xlu0 %139 }
  0x8f   :  { %v151_v8 = vsel %vm911_vm8, %v140_v44, %v124_v2 }
  0x91   :  { %v136_v34 = vpop.permute.xlu1 %135 }
  0x93   :  { %v90_v51 = vpop.permute.xlu0 %89 }
  0x96   :  { %v62_v36 = vpop.permute.xlu1 %61 }
  0x97   :  { %v71_v1 = vsel %vm884_vm5, %v62_v36, 0.0  ;;  %v449_v36 = vld [vmem:[%s996_s6] sm:$0xff] }
  0x98   :  { %v109_v61 = vpop.permute.xlu0 %108  ;;  %v98_v7 = vsel %vm889_vm6, %v90_v51, %v71_v1  ;;  %682 = vmatprep.mubr.msk.f32.mxu0 %vm477_vm9, %v449_v36 }
  0x99   :  { %v123_v4 = vsel %vm899_vm7, %v109_v61, %v96_v62 }
  0x9a   :  { %v67_v41 = vpop.permute.xlu1 %66  ;;  %v150_v13 = vsel %vm911_vm8, %v136_v34, %v123_v4  ;;  %v262_v34 = vld [vmem:[%s992_s4 + $0x30] sm:$0xff] }
  0x9b   :  { %v72_v63 = vsel %vm884_vm5, %v67_v41, 0.0 }
  0x9c   :  { %v121_v6 = vpop.permute.xlu0 %120 }
  0x9f   :  { %v94_v45 = vpop.permute.xlu1 %93 }
  0xa0   :  { %v99_v5 = vsel %vm889_vm6, %v94_v45, %v72_v63 }
  0xa1   :  { %v126_v10 = vsel %vm899_vm7, %v121_v6, %v99_v5  ;;  %v275_v38 = vpop.permute.xlu0 %274 }
  0xa4   :  { %v117_v52 = vpop.permute.xlu1 %116 }
  0xa5   :  { %v125_v15 = vsel %vm899_vm7, %v117_v52, %v98_v7  ;;  %v290_v40 = vpop.permute.xlu0 %289 }
  0xa9   :  { %v144_v0 = vpop.permute.xlu1 %143  ;;  %v300_v51 = vpop.permute.xlu0 %299 }
  0xaa   :  { %v152_v22 = vsel %vm911_vm8, %v144_v0, %v125_v15 }
  0xad   :  { %v148_v11 = vpop.permute.xlu1 %147  ;;  %v310_v63 = vpop.permute.xlu0 %309 }
  0xae   :  { %v153_v19 = vsel %vm911_vm8, %v148_v11, %v126_v10  ;;  %v450_v10 = vld [vmem:[%s996_s6 + $0x8] sm:$0xff]  ;;  %v452_v11 = vld [vmem:[%s996_s6 + $0x18] sm:$0xff] }
  0xb2   :  { %v280_v39 = vpop.permute.xlu1 %279 }
  0xb6   :  { %v285_v42 = vpop.permute.xlu1 %284 }
  0xba   :  { %v295_v54 = vpop.permute.xlu1 %294 }
  0xbe   :  { %v305_v2 = vpop.permute.xlu1 %304 }
  0xdf   :  { %v642_v9 = vpop.f32.mrb[0].mxu0 }
  0xe0   :  { %v239_v12 = vadd.f32 %v642_v9, %v151_v8  ;;  %v233_v14 = vpop.f32.mrb[1].mxu0 }
  0xe1   :  { %v234_v16 = vadd.f32 %v233_v14, %v150_v13  ;;  %v465_v13 = vpop.permute.xlu0 %464 }
  0xe2   :  { %v253_v17 = vmax.f32 %v239_v12, 0.0  ;;  %v460_v12 = vpop.permute.xlu1 %459 }
  0xe3   :  { %v252_v18 = vmax.f32 %v234_v16, 0.0  ;;  %v645_v20 = vpop.f32.mrb[2].mxu0 }
  0xe4   :  { %v249_v21 = vadd.f32 %v645_v20, %v153_v19  ;;  %v243_v23 = vpop.f32.mrb[3].mxu0 }
  0xe5   :  { %v244_v24 = vadd.f32 %v243_v23, %v152_v22  ;;  %v696_v25 = vpack.c.bf16 %v253_v17, %v252_v18  ;;  %v475_v15 = vpop.permute.xlu0 %474 }
  0xe6   :  { %v255_v26 = vmax.f32 %v249_v21, 0.0  ;;  %v470_v14 = vpop.permute.xlu1 %469 }
  0xe7   :  { %v254_v27 = vmax.f32 %v244_v24, 0.0  ;;  %697 = vmatprep.subr.bf16.mxu1 %v696_v25 }
  0xe8   :  { %699 = vmatpush3.bf16.msra.mxu1 %v696_v25 }
  0xe9   :  { %v700_v28 = vpack.c.bf16 %v255_v26, %v254_v27 }
  0xeb   :  { %701 = vmatprep.subr.bf16.mxu1 %v700_v28 }
  0xec   :  { %703 = vmatpush3.bf16.msra.mxu1 %v700_v28 }
  0xef   :  { %655 = vmatmul.mubr.msk.f32.vlgmr.msra.gmra.mrb[0].mxu1 %vm154_vm0, %v257_v29 }
  0xf0   :  { %657 = vmatprep.mubr.msk.f32.mxu1 %vm154_vm0, %v258_v30 }
  0xf3   :  { %658 = vmatmul.mubr.msk.f32.gmra.mrb[2].mxu1 %vm154_vm0, %v259_v31 }
  0xf4   :  { %660 = vmatprep.mubr.msk.f32.mxu1 %vm154_vm0, %v260_v32 }
  0xf7   :  { %661 = vmatmul.mubr.msk.f32.gmra.mrb[4].mxu1 %vm154_vm0, %v261_v33 }
  0xf8   :  { %663 = vmatprep.mubr.msk.f32.mxu1 %vm154_vm0, %v262_v34 }
  0xfb   :  { %664 = vmatmul.mubr.msk.f32.gmra.mrb[6].mxu1 %vm154_vm0, %v263_v35 }
  0xfc   :  { %685 = vmatprep.mubr.msk.f32.mxu1 %vm477_vm9, %v451_v37 }
 0x1c2   :  { %v656_v41 = vpop.f32.mrb[0].mxu1 }
 0x1c3   :  { %v408_v43 = vadd.f32 %v656_v41, %v280_v39  ;;  %v402_v44 = vpop.f32.mrb[1].mxu1 }
 0x1c4   :  { %v403_v45 = vadd.f32 %v402_v44, %v275_v38 }
 0x1c5   :  { %v442_v46 = vmax.f32 %v408_v43, 0.0 }
 0x1c6   :  { %v441_v47 = vmax.f32 %v403_v45, 0.0  ;;  %v659_v48 = vpop.f32.mrb[2].mxu1 }
 0x1c7   :  { %v418_v49 = vadd.f32 %v659_v48, %v290_v40  ;;  %v412_v50 = vpop.f32.mrb[3].mxu1 }
 0x1c8   :  { %v704_v52 = vpack.c.bf16 %v442_v46, %v441_v47  ;;  %v413_v53 = vadd.f32 %v412_v50, %v285_v42 }
 0x1c9   :  { %v444_v55 = vmax.f32 %v418_v49, 0.0 }
 0x1ca   :  { %v443_v56 = vmax.f32 %v413_v53, 0.0  ;;  %v662_v57 = vpop.f32.mrb[4].mxu1  ;;  %705 = vmatprep.subr.bf16.mxu0 %v704_v52  ;;  %720 = vmatprep.subr.bf16.mxu1 %v704_v52 }
 0x1cb   :  { %v428_v58 = vadd.f32 %v662_v57, %v300_v51  ;;  %v422_v59 = vpop.f32.mrb[5].mxu1  ;;  %707 = vmatpush3.bf16.msra.mxu0 %v704_v52  ;;  %724 = vmatpush3.bf16.msra.mxu1 %v704_v52 }
 0x1cc   :  { %v708_v60 = vpack.c.bf16 %v444_v55, %v443_v56  ;;  %v423_v61 = vadd.f32 %v422_v59, %v295_v54 }
 0x1cd   :  { %v446_v62 = vmax.f32 %v428_v58, 0.0 }
 0x1ce   :  { %v445_v0 = vmax.f32 %v423_v61, 0.0  ;;  %v665_v1 = vpop.f32.mrb[6].mxu1  ;;  %709 = vmatprep.subr.bf16.mxu0 %v708_v60  ;;  %721 = vmatprep.subr.bf16.mxu1 %v708_v60 }
 0x1cf   :  { %v438_v3 = vadd.f32 %v665_v1, %v310_v63  ;;  %v432_v4 = vpop.f32.mrb[7].mxu1  ;;  %711 = vmatpush3.bf16.msra.mxu0 %v708_v60  ;;  %725 = vmatpush3.bf16.msra.mxu1 %v708_v60 }
 0x1d0   :  { %v712_v5 = vpack.c.bf16 %v446_v62, %v445_v0  ;;  %v433_v6 = vadd.f32 %v432_v4, %v305_v2 }
 0x1d1   :  { %v448_v7 = vmax.f32 %v438_v3, 0.0 }
 0x1d2   :  { %v447_v8 = vmax.f32 %v433_v6, 0.0  ;;  %713 = vmatprep.subr.bf16.mxu0 %v712_v5  ;;  %722 = vmatprep.subr.bf16.mxu1 %v712_v5 }
 0x1d3   :  { %715 = vmatpush3.bf16.msra.mxu0 %v712_v5  ;;  %726 = vmatpush3.bf16.msra.mxu1 %v712_v5 }
 0x1d4   :  { %v716_v9 = vpack.c.bf16 %v448_v7, %v447_v8 }
 0x1d6   :  { %717 = vmatprep.subr.bf16.mxu0 %v716_v9  ;;  %723 = vmatprep.subr.bf16.mxu1 %v716_v9 }
 0x1d7   :  { %719 = vmatpush3.bf16.msra.mxu0 %v716_v9  ;;  %727 = vmatpush3.bf16.msra.mxu1 %v716_v9 }
 0x1da   :  { %683 = vmatmul.mubr.msk.f32.vlgmr.msra.gmra.mrb[4].mxu0 %vm477_vm9, %v450_v10  ;;  %686 = vmatmul.mubr.msk.f32.vlgmr.msra.gmra.mrb[8].mxu1 %vm477_vm9, %v452_v11 }
 0x2ad   :  { %v684_v16 = vpop.f32.mrb[4].mxu0  ;;  %v687_v17 = vpop.f32.mrb[8].mxu1 }
 0x2ae   :  { %v562_v18 = vadd.f32 %v684_v16, %v465_v13  ;;  %v572_v19 = vadd.f32 %v687_v17, %v475_v15  ;;  %v556_v20 = vpop.f32.mrb[5].mxu0  ;;  %v566_v21 = vpop.f32.mrb[9].mxu1 }
 0x2af   :  { %v557_v22 = vadd.f32 %v556_v20, %v460_v12  ;;  %v567_v23 = vadd.f32 %v566_v21, %v470_v14 }
 0x2b0   :  { %577 = vst.msk [vmem:[%s997_s8 + $0x8] sm:$0xff] %vm575_vm10, %v562_v18  ;;  %579 = vst.msk [vmem:[%s997_s8 + $0x18] sm:$0xff] %vm575_vm10, %v572_v19 }
 0x2b1   :  { %576 = vst.msk [vmem:[%s997_s8] sm:$0xff] %vm575_vm10, %v557_v22  ;;  %578 = vst.msk [vmem:[%s997_s8 + $0x10] sm:$0xff] %vm575_vm10, %v567_v23 }

</bundles_post_ra>
